<compile_context>
chip_gen: v7x
topology: tpu7x:2x2x1
jax: 0.10.0
libtpu: 0.0.40
codegen_flags: <defaults>
</compile_context>

<pallas_src>
from functools import partial

import jax
import jax.numpy as jnp
from jax.experimental import pallas as pl
from jax.experimental.pallas import tpu as pltpu


def _round_up(x, m):
    return ((x + m - 1) // m) * m


def _pick_tile(dim_pad, pref):
    """Largest multiple of 128 <= pref that divides dim_pad (dim_pad % 128 == 0)."""
    t = min(pref, dim_pad)
    t = (t // 128) * 128
    while dim_pad % t != 0:
        t -= 128
    return t


def _sublane_min(*dtypes):
    """Minimum second-to-last tile granularity for the given dtypes."""
    m = 8
    for d in dtypes:
        isz = jnp.dtype(d).itemsize
        if isz == 2:
            m = max(m, 16)
        elif isz == 1:
            m = max(m, 32)
    return m


def _vmem_capacity_bytes():
    """Physical VMEM per TensorCore; conservative default if query fails."""
    try:
        return int(pltpu.get_tpu_info().vmem_capacity_bytes)
    except Exception:
        return 128 * 1024 * 1024


def _pad_cast(a, shape, dtype):
    """Zero-pad `a` into `shape` with dtype `dtype`; skip the copy if aligned."""
    shape = tuple(shape)
    if a.shape == shape:
        return a.astype(dtype)
    z = jnp.zeros(shape, dtype)
    return z.at[tuple(slice(0, s) for s in a.shape)].set(a.astype(dtype))


# --------------------------------------------------------------------------
# Fused whole-MLP kernel: all weights/biases resident in VMEM, layer loop
# runs inside the kernel, only the final activation is written back to HBM.
# --------------------------------------------------------------------------
def _mlp_fused_kernel(*refs, num_layers, relu_flags, res_flags, compute_dtype):
    x_ref = refs[0]
    w_refs = refs[1:1 + num_layers]
    b_refs = refs[1 + num_layers:1 + 2 * num_layers]
    o_ref = refs[1 + 2 * num_layers]

    x = x_ref[...].astype(jnp.float32)      # f32 between layers (epilogue precision)
    for i in range(num_layers):
        y = jnp.dot(x.astype(compute_dtype), w_refs[i][...],
                    preferred_element_type=jnp.float32)
        y = y + b_refs[i][...]              # f32 epilogue
        if relu_flags[i]:
            y = jnp.maximum(y, 0.0)
        if res_flags[i]:
            y = y + x                        # residual = layer input
        x = y
    o_ref[...] = x.astype(o_ref.dtype)


def pallas_mlp_fused(x, weights, biases, relu_flags, res_flags, *,
                     compute_dtype, tile_m, vmem_limit):
    N, K0 = x.shape
    num_layers = len(weights)

    dims = [K0] + [w.shape[1] for w in weights]
    pdims = [_round_up(d, 128) for d in dims]     # lane-dense feature dims

    n_pad = _round_up(N, tile_m)
    # v7x: make sure >= 2 row tiles so both TensorCores get work.
    while n_pad // tile_m < 2 and tile_m >= 256 and (tile_m // 2) % 128 == 0:
        tile_m //= 2
        n_pad = _round_up(N, tile_m)

    xp = _pad_cast(x, (n_pad, pdims[0]), compute_dtype)
    wp, bp = [], []
    for i, (w, b) in enumerate(zip(weights, biases)):
        wp.append(_pad_cast(w, (pdims[i], pdims[i + 1]), compute_dtype))
        bp.append(_pad_cast(b.reshape(1, -1), (1, pdims[i + 1]), jnp.float32))

    kernel = partial(_mlp_fused_kernel, num_layers=num_layers,
                     relu_flags=tuple(relu_flags), res_flags=tuple(res_flags),
                     compute_dtype=compute_dtype)

    def call(single_buffer_consts):
        kw = ({"pipeline_mode": pl.Buffered(1)} if single_buffer_consts else {})
        in_specs = [pl.BlockSpec((tile_m, pdims[0]), lambda r: (r, 0))]
        for i in range(num_layers):
            in_specs.append(
                pl.BlockSpec((pdims[i], pdims[i + 1]), lambda r: (0, 0), **kw))
        for i in range(num_layers):
            in_specs.append(
                pl.BlockSpec((1, pdims[i + 1]), lambda r: (0, 0), **kw))
        return pl.pallas_call(
            kernel,
            out_shape=jax.ShapeDtypeStruct((n_pad, pdims[-1]), x.dtype),
            grid=(n_pad // tile_m,),
            in_specs=in_specs,
            out_specs=pl.BlockSpec((tile_m, pdims[-1]), lambda r: (r, 0)),
            compiler_params=pltpu.CompilerParams(
                dimension_semantics=("parallel",),
                vmem_limit_bytes=vmem_limit),
        )(xp, *wp, *bp)

    try:
        out = call(True)
    except Exception:
        # Buffered(1) unsupported by this Pallas build: fall back to the
        # default double-buffered pipeline for the resident weights/biases.
        out = call(False)
    return out[:N, :dims[-1]]


# --------------------------------------------------------------------------
# Fallback: per-layer Linear with (M, N, K) tiling + f32 VMEM accumulator.
# Bias / ReLU / residual epilogue only on the last K step (pl.when).
# Operates on already-padded, kernel-native-layout arrays.
# --------------------------------------------------------------------------
def _linear_tiled_kernel(*refs, apply_relu, has_residual):
    if has_residual:
        x_ref, w_ref, b_ref, r_ref, o_ref, acc_ref = refs
    else:
        x_ref, w_ref, b_ref, o_ref, acc_ref = refs
        r_ref = None
    k = pl.program_id(2)

    @pl.when(k == 0)
    def _():
        acc_ref[...] = jnp.zeros_like(acc_ref)

    acc_ref[...] += jnp.dot(x_ref[...], w_ref[...],
                            preferred_element_type=jnp.float32)

    @pl.when(k == pl.num_programs(2) - 1)
    def _():
        y = acc_ref[...] + b_ref[...]
        if apply_relu:
            y = jnp.maximum(y, 0.0)
        if has_residual:
            y = y + r_ref[...].astype(jnp.float32)
        o_ref[...] = y.astype(o_ref.dtype)


def pallas_linear_tiled_padded(xp, wp, bp, residual_p=None, *, apply_relu,
                               out_dtype, tile_m, tile_n=512, tile_k=1024,
                               vmem_limit=48 * 1024 * 1024):
    n_pad, k_pad = xp.shape
    k_pad2, m_pad = wp.shape
    assert k_pad == k_pad2 and n_pad % tile_m == 0
    tile_n = _pick_tile(m_pad, tile_n)
    tile_k = _pick_tile(k_pad, tile_k)

    in_specs = [
        pl.BlockSpec((tile_m, tile_k), lambda i, j, k: (i, k)),
        pl.BlockSpec((tile_k, tile_n), lambda i, j, k: (k, j)),
        pl.BlockSpec((1, tile_n), lambda i, j, k: (0, j)),
    ]
    args = [xp, wp, bp]
    if residual_p is not None:
        in_specs.append(pl.BlockSpec((tile_m, tile_n), lambda i, j, k: (i, j)))
        args.append(residual_p)

    kernel = partial(_linear_tiled_kernel, apply_relu=apply_relu,
                     has_residual=residual_p is not None)

    return pl.pallas_call(
        kernel,
        out_shape=jax.ShapeDtypeStruct((n_pad, m_pad), out_dtype),
        grid=(n_pad // tile_m, m_pad // tile_n, k_pad // tile_k),
        in_specs=in_specs,
        out_specs=pl.BlockSpec((tile_m, tile_n), lambda i, j, k: (i, j)),
        scratch_shapes=[pltpu.VMEM((tile_m, tile_n), jnp.float32)],
        compiler_params=pltpu.CompilerParams(
            dimension_semantics=("parallel", "parallel", "arbitrary"),
            vmem_limit_bytes=vmem_limit),
    )(*args)


# --------------------------------------------------------------------------
# Forward pass mirroring MLP.forward (eval-mode dropout).
# --------------------------------------------------------------------------
def mlp_forward(x, params, *, residual=False, compute_dtype=jnp.bfloat16,
                use_fused=None, tile_m=None):
    weights = [w for w, _ in params]
    biases = [b for _, b in params]
    num_layers = len(params)
    N, K0 = x.shape
    relu_flags = [True] * (num_layers - 1) + [False]

    dims = [K0] + [w.shape[1] for w in weights]
    pdims = [_round_up(d, 128) for d in dims]

    # Residual applies only when the (unpadded) activation shapes match.
    res_flags = []
    prev_dim = K0
    for w in weights:
        out_dim = w.shape[1]
        res_flags.append(bool(residual) and prev_dim == out_dim)
        prev_dim = out_dim

    # Generation-aware VMEM budgets (v7x-class parts have 64 MiB per TC).
    vmem_cap = _vmem_capacity_bytes()
    small_vmem = vmem_cap <= 64 * 1024 * 1024
    vmem_limit = (40 if small_vmem else 48) * 1024 * 1024
    fuse_gate = (20 if small_vmem else 32) * 1024 * 1024

    sub = _sublane_min(compute_dtype, x.dtype)
    if tile_m is None:
        tile_m = 256 if (small_vmem or N < 512) else 512
    tile_m = max(sub, min(tile_m, _round_up(N, sub)))

    if use_fused is None:
        c_item = jnp.dtype(compute_dtype).itemsize
        o_item = jnp.dtype(x.dtype).itemsize
        # Weights/biases single-buffered (Buffered(1)), input/output double-buffered,
        # f32 inter-layer activations (x2 when the residual keeps two alive).
        wbytes = sum(pdims[i] * pdims[i + 1] * c_item + pdims[i + 1] * 4
                     for i in range(num_layers))
        iobytes = 2 * tile_m * (pdims[0] * c_item + pdims[-1] * o_item)
        actbytes = sum(tile_m * d * 4 for d in pdims[1:])
        if residual:
            actbytes *= 2
        est = wbytes + iobytes + actbytes + (2 << 20)   # + compiler scratch headroom
        use_fused = est <= fuse_gate

    if use_fused:
        return pallas_mlp_fused(x, weights, biases, relu_flags, res_flags,
                                compute_dtype=compute_dtype, tile_m=tile_m,
                                vmem_limit=vmem_limit)

    # Large-layer fallback: per-layer K/N-tiled matmul with f32 accumulator.
    # Activations stay padded, in compute_dtype, between layers; slice + cast once.
    n_pad = _round_up(N, tile_m)
    act = _pad_cast(x, (n_pad, pdims[0]), compute_dtype)
    for i in range(num_layers):
        wp = _pad_cast(weights[i], (pdims[i], pdims[i + 1]), compute_dtype)
        bp = _pad_cast(biases[i].reshape(1, -1), (1, pdims[i + 1]), jnp.float32)
        res = act if res_flags[i] else None
        is_last = i == num_layers - 1
        out_dt = jnp.float32 if is_last else compute_dtype
        act = pallas_linear_tiled_padded(
            act, wp, bp, res, apply_relu=relu_flags[i], out_dtype=out_dt,
            tile_m=tile_m, vmem_limit=vmem_limit)
    return act[:N, :dims[-1]].astype(x.dtype)


def init_mlp_params(key, in_channels, hidden_channels, out_channels, num_layers):
    """Synthetic params matching the PyTorch MLP shapes (weights stored (in, out))."""
    dims = []
    if num_layers == 1:
        dims.append((in_channels, out_channels))
    else:
        dims.append((in_channels, hidden_channels))
        for _ in range(num_layers - 2):
            dims.append((hidden_channels, hidden_channels))
        dims.append((hidden_channels, out_channels))

    params = []
    for (din, dout) in dims:
        key, kw, kb = jax.random.split(key, 3)
        bound = 1.0 / jnp.sqrt(jnp.float32(din))
        w = jax.random.uniform(kw, (din, dout), jnp.float32, -bound, bound)
        b = jax.random.uniform(kb, (dout,), jnp.float32, -bound, bound)
        params.append((w, b))
    return params


def mlp_reference(x, params, *, residual=False):
    """Pure-JAX reference for correctness checking."""
    x_prev = x
    for (w, b) in params[:-1]:
        y = jnp.maximum(x @ w + b, 0.0)
        if residual and x_prev.shape == y.shape:
            y = y + x_prev
        x = y
        x_prev = x
    w, b = params[-1]
    y = x @ w + b
    if residual and x_prev.shape == y.shape:
        y = y + x_prev
    return y


if __name__ == "__main__":
    key = jax.random.PRNGKey(0)
    k_x, k_p = jax.random.split(key)

    # Small shapes consistent with the module: N nodes, feature dims.
    N, in_channels, hidden_channels, out_channels, num_layers = 16, 32, 32, 32, 3

    x = jax.random.normal(k_x, (N, in_channels), jnp.float32)
    params = init_mlp_params(k_p, in_channels, hidden_channels, out_channels,
                             num_layers)
    ref = mlp_reference(x, params, residual=False)
    ref_r = mlp_reference(x, params, residual=True)

    # 1) Default path: fused kernel, bf16 MXU inputs + f32 accumulation/epilogue.
    out = jax.block_until_ready(mlp_forward(x, params, residual=False))
    assert out.shape == (N, out_channels)
    assert jnp.allclose(out, ref, atol=1e-1, rtol=1e-1)

    # 2) Fused path, full-f32 compute (tight tolerance).
    out_f = jax.block_until_ready(
        mlp_forward(x, params, residual=False, compute_dtype=jnp.float32))
    assert jnp.allclose(out_f, ref, atol=1e-5, rtol=1e-5)

    # 3) Residual path, f32 (all dims equal -> residual adds active).
    out_r = jax.block_until_ready(
        mlp_forward(x, params, residual=True, compute_dtype=jnp.float32))
    assert jnp.allclose(out_r, ref_r, atol=1e-5, rtol=1e-5)

    # 4) Per-layer tiled fallback, ragged row count (exercises padding), f32.
    x13 = x[:13]
    out_t = jax.block_until_ready(
        mlp_forward(x13, params, residual=False, use_fused=False,
                    compute_dtype=jnp.float32))
    assert jnp.allclose(out_t, mlp_reference(x13, params, residual=False),
                        atol=1e-5, rtol=1e-5)

    # 5) Fallback chain with padded bf16 inter-layer activations + residual.
    out_tb = jax.block_until_ready(
        mlp_forward(x, params, residual=True, use_fused=False))
    assert jnp.allclose(out_tb, ref_r, atol=1e-1, rtol=1e-1)

    print("KERNEL_OK")
</pallas_src>

<mosaic_0001>
module attributes {stable_mosaic.version = 11 : i64} {
  func.func @_mlp_fused_kernel(%arg0: i32, %arg1: memref<16x128xbf16, #tpu.memory_space<vmem>>, %arg2: memref<128x128xbf16, #tpu.memory_space<vmem>>, %arg3: memref<128x128xbf16, #tpu.memory_space<vmem>>, %arg4: memref<128x128xbf16, #tpu.memory_space<vmem>>, %arg5: memref<1x128xf32, #tpu.memory_space<vmem>>, %arg6: memref<1x128xf32, #tpu.memory_space<vmem>>, %arg7: memref<1x128xf32, #tpu.memory_space<vmem>>, %arg8: memref<16x128xf32, #tpu.memory_space<vmem>>) attributes {dimension_semantics = [#tpu.dimension_semantics<parallel>], iteration_bounds = array<i64: 1>, scalar_prefetch = 0 : i64, scratch_operands = 0 : i64, tpu.core_type = #tpu.core_type<tc>, window_params = [{transform_indices = @transform_0, window_bounds = array<i64: 16, 128>}, {pipeline_mode = #tpu.pipeline_mode<synchronous>, transform_indices = @transform_1, window_bounds = array<i64: 128, 128>}, {pipeline_mode = #tpu.pipeline_mode<synchronous>, transform_indices = @transform_2, window_bounds = array<i64: 128, 128>}, {pipeline_mode = #tpu.pipeline_mode<synchronous>, transform_indices = @transform_3, window_bounds = array<i64: 128, 128>}, {pipeline_mode = #tpu.pipeline_mode<synchronous>, transform_indices = @transform_4, window_bounds = array<i64: 1, 128>}, {pipeline_mode = #tpu.pipeline_mode<synchronous>, transform_indices = @transform_5, window_bounds = array<i64: 1, 128>}, {pipeline_mode = #tpu.pipeline_mode<synchronous>, transform_indices = @transform_6, window_bounds = array<i64: 1, 128>}, {transform_indices = @transform_7, window_bounds = array<i64: 16, 128>}]} {
    %c0 = arith.constant 0 : index
    %c0_0 = arith.constant 0 : index
    %0 = vector.load %arg1[%c0, %c0_0] : memref<16x128xbf16, #tpu.memory_space<vmem>>, vector<16x128xbf16>
    %1 = arith.extf %0 : vector<16x128xbf16> to vector<16x128xf32>
    %2 = arith.truncf %1 : vector<16x128xf32> to vector<16x128xbf16>
    %c0_1 = arith.constant 0 : index
    %c0_2 = arith.constant 0 : index
    %3 = vector.load %arg2[%c0_1, %c0_2] : memref<128x128xbf16, #tpu.memory_space<vmem>>, vector<128x128xbf16>
    %cst = arith.constant dense<0.000000e+00> : vector<16x128xf32>
    %4 = tpu.matmul %2, %3, %cst {dimension_numbers = #tpu.dot_dimension_numbers<[1], [0], [0], [1], [0, 0, 1, 1], [], []>} : vector<16x128xbf16>, vector<128x128xbf16>, vector<16x128xf32> -> vector<16x128xf32>
    %c0_3 = arith.constant 0 : index
    %c0_4 = arith.constant 0 : index
    %5 = vector.load %arg5[%c0_3, %c0_4] : memref<1x128xf32, #tpu.memory_space<vmem>>, vector<1x128xf32>
    %6 = vector.broadcast %5 : vector<1x128xf32> to vector<16x128xf32>
    %7 = arith.addf %4, %6 : vector<16x128xf32>
    %cst_5 = arith.constant 0.000000e+00 : f32
    %8 = vector.broadcast %cst_5 : f32 to vector<16x128xf32>
    %9 = arith.maximumf %7, %8 : vector<16x128xf32>
    %10 = arith.truncf %9 : vector<16x128xf32> to vector<16x128xbf16>
    %c0_6 = arith.constant 0 : index
    %c0_7 = arith.constant 0 : index
    %11 = vector.load %arg3[%c0_6, %c0_7] : memref<128x128xbf16, #tpu.memory_space<vmem>>, vector<128x128xbf16>
    %cst_8 = arith.constant dense<0.000000e+00> : vector<16x128xf32>
    %12 = tpu.matmul %10, %11, %cst_8 {dimension_numbers = #tpu.dot_dimension_numbers<[1], [0], [0], [1], [0, 0, 1, 1], [], []>} : vector<16x128xbf16>, vector<128x128xbf16>, vector<16x128xf32> -> vector<16x128xf32>
    %c0_9 = arith.constant 0 : index
    %c0_10 = arith.constant 0 : index
    %13 = vector.load %arg6[%c0_9, %c0_10] : memref<1x128xf32, #tpu.memory_space<vmem>>, vector<1x128xf32>
    %14 = vector.broadcast %13 : vector<1x128xf32> to vector<16x128xf32>
    %15 = arith.addf %12, %14 : vector<16x128xf32>
    %cst_11 = arith.constant 0.000000e+00 : f32
    %16 = vector.broadcast %cst_11 : f32 to vector<16x128xf32>
    %17 = arith.maximumf %15, %16 : vector<16x128xf32>
    %18 = arith.truncf %17 : vector<16x128xf32> to vector<16x128xbf16>
    %c0_12 = arith.constant 0 : index
    %c0_13 = arith.constant 0 : index
    %19 = vector.load %arg4[%c0_12, %c0_13] : memref<128x128xbf16, #tpu.memory_space<vmem>>, vector<128x128xbf16>
    %cst_14 = arith.constant dense<0.000000e+00> : vector<16x128xf32>
    %20 = tpu.matmul %18, %19, %cst_14 {dimension_numbers = #tpu.dot_dimension_numbers<[1], [0], [0], [1], [0, 0, 1, 1], [], []>} : vector<16x128xbf16>, vector<128x128xbf16>, vector<16x128xf32> -> vector<16x128xf32>
    %c0_15 = arith.constant 0 : index
    %c0_16 = arith.constant 0 : index
    %21 = vector.load %arg7[%c0_15, %c0_16] : memref<1x128xf32, #tpu.memory_space<vmem>>, vector<1x128xf32>
    %22 = vector.broadcast %21 : vector<1x128xf32> to vector<16x128xf32>
    %23 = arith.addf %20, %22 : vector<16x128xf32>
    %c0_17 = arith.constant 0 : index
    %c0_18 = arith.constant 0 : index
    %24 = vector.load %arg8[%c0_17, %c0_18] : memref<16x128xf32, #tpu.memory_space<vmem>>, vector<16x128xf32>
    tpu.vector_store %arg8[%c0_17, %c0_18], %23 {strides = array<i32>} : memref<16x128xf32, #tpu.memory_space<vmem>>, vector<16x128xf32>,
    return
  }
  func.func @transform_0(%arg0: i32) -> (i32, i32) {
    %c0_i32 = arith.constant 0 : i32
    %c0_i32_0 = arith.constant 0 : i32
    return %arg0, %c0_i32 : i32, i32
  }
  func.func @transform_1(%arg0: i32) -> (i32, i32) {
    %c0_i32 = arith.constant 0 : i32
    %c0_i32_0 = arith.constant 0 : i32
    %c0_i32_1 = arith.constant 0 : i32
    return %c0_i32, %c0_i32_0 : i32, i32
  }
  func.func @transform_2(%arg0: i32) -> (i32, i32) {
    %c0_i32 = arith.constant 0 : i32
    %c0_i32_0 = arith.constant 0 : i32
    %c0_i32_1 = arith.constant 0 : i32
    return %c0_i32, %c0_i32_0 : i32, i32
  }
  func.func @transform_3(%arg0: i32) -> (i32, i32) {
    %c0_i32 = arith.constant 0 : i32
    %c0_i32_0 = arith.constant 0 : i32
    %c0_i32_1 = arith.constant 0 : i32
    return %c0_i32, %c0_i32_0 : i32, i32
  }
  func.func @transform_4(%arg0: i32) -> (i32, i32) {
    %c0_i32 = arith.constant 0 : i32
    %c0_i32_0 = arith.constant 0 : i32
    %c0_i32_1 = arith.constant 0 : i32
    return %c0_i32, %c0_i32_0 : i32, i32
  }
  func.func @transform_5(%arg0: i32) -> (i32, i32) {
    %c0_i32 = arith.constant 0 : i32
    %c0_i32_0 = arith.constant 0 : i32
    %c0_i32_1 = arith.constant 0 : i32
    return %c0_i32, %c0_i32_0 : i32, i32
  }
  func.func @transform_6(%arg0: i32) -> (i32, i32) {
    %c0_i32 = arith.constant 0 : i32
    %c0_i32_0 = arith.constant 0 : i32
    %c0_i32_1 = arith.constant 0 : i32
    return %c0_i32, %c0_i32_0 : i32, i32
  }
  func.func @transform_7(%arg0: i32) -> (i32, i32) {
    %c0_i32 = arith.constant 0 : i32
    %c0_i32_0 = arith.constant 0 : i32
    return %arg0, %c0_i32 : i32, i32
  }
}

module attributes {stable_mosaic.version = 11 : i64} {
  func.func @_mlp_fused_kernel(%arg0: i32, %arg1: memref<16x128xbf16, #tpu.memory_space<vmem>>, %arg2: memref<128x128xbf16, #tpu.memory_space<vmem>>, %arg3: memref<128x128xbf16, #tpu.memory_space<vmem>>, %arg4: memref<128x128xbf16, #tpu.memory_space<vmem>>, %arg5: memref<1x128xf32, #tpu.memory_space<vmem>>, %arg6: memref<1x128xf32, #tpu.memory_space<vmem>>, %arg7: memref<1x128xf32, #tpu.memory_space<vmem>>, %arg8: memref<16x128xf32, #tpu.memory_space<vmem>>) attributes {dimension_semantics = [#tpu.dimension_semantics<parallel>], iteration_bounds = array<i64: 1>, scalar_prefetch = 0 : i64, scratch_operands = 0 : i64, tpu.core_type = #tpu.core_type<tc>, window_params = [{transform_indices = @transform_0, window_bounds = array<i64: 16, 128>}, {pipeline_mode = #tpu.pipeline_mode<synchronous>, transform_indices = @transform_1, window_bounds = array<i64: 128, 128>}, {pipeline_mode = #tpu.pipeline_mode<synchronous>, transform_indices = @transform_2, window_bounds = array<i64: 128, 128>}, {pipeline_mode = #tpu.pipeline_mode<synchronous>, transform_indices = @transform_3, window_bounds = array<i64: 128, 128>}, {pipeline_mode = #tpu.pipeline_mode<synchronous>, transform_indices = @transform_4, window_bounds = array<i64: 1, 128>}, {pipeline_mode = #tpu.pipeline_mode<synchronous>, transform_indices = @transform_5, window_bounds = array<i64: 1, 128>}, {pipeline_mode = #tpu.pipeline_mode<synchronous>, transform_indices = @transform_6, window_bounds = array<i64: 1, 128>}, {transform_indices = @transform_7, window_bounds = array<i64: 16, 128>}]} {
    %c0 = arith.constant 0 : index
    %c0_0 = arith.constant 0 : index
    %0 = vector.load %arg1[%c0, %c0_0] : memref<16x128xbf16, #tpu.memory_space<vmem>>, vector<16x128xbf16>
    %1 = arith.extf %0 : vector<16x128xbf16> to vector<16x128xf32>
    %2 = arith.truncf %1 : vector<16x128xf32> to vector<16x128xbf16>
    %c0_1 = arith.constant 0 : index
    %c0_2 = arith.constant 0 : index
    %3 = vector.load %arg2[%c0_1, %c0_2] : memref<128x128xbf16, #tpu.memory_space<vmem>>, vector<128x128xbf16>
    %cst = arith.constant dense<0.000000e+00> : vector<16x128xf32>
    %4 = tpu.matmul %2, %3, %cst {dimension_numbers = #tpu.dot_dimension_numbers<[1], [0], [0], [1], [0, 0, 1, 1], [], []>} : vector<16x128xbf16>, vector<128x128xbf16>, vector<16x128xf32> -> vector<16x128xf32>
    %c0_3 = arith.constant 0 : index
    %c0_4 = arith.constant 0 : index
    %5 = vector.load %arg5[%c0_3, %c0_4] : memref<1x128xf32, #tpu.memory_space<vmem>>, vector<1x128xf32>
    %6 = vector.broadcast %5 : vector<1x128xf32> to vector<16x128xf32>
    %7 = arith.addf %4, %6 : vector<16x128xf32>
    %cst_5 = arith.constant 0.000000e+00 : f32
    %8 = vector.broadcast %cst_5 : f32 to vector<16x128xf32>
    %9 = arith.maximumf %7, %8 : vector<16x128xf32>
    %10 = arith.truncf %9 : vector<16x128xf32> to vector<16x128xbf16>
    %c0_6 = arith.constant 0 : index
    %c0_7 = arith.constant 0 : index
    %11 = vector.load %arg3[%c0_6, %c0_7] : memref<128x128xbf16, #tpu.memory_space<vmem>>, vector<128x128xbf16>
    %cst_8 = arith.constant dense<0.000000e+00> : vector<16x128xf32>
    %12 = tpu.matmul %10, %11, %cst_8 {dimension_numbers = #tpu.dot_dimension_numbers<[1], [0], [0], [1], [0, 0, 1, 1], [], []>} : vector<16x128xbf16>, vector<128x128xbf16>, vector<16x128xf32> -> vector<16x128xf32>
    %c0_9 = arith.constant 0 : index
    %c0_10 = arith.constant 0 : index
    %13 = vector.load %arg6[%c0_9, %c0_10] : memref<1x128xf32, #tpu.memory_space<vmem>>, vector<1x128xf32>
    %14 = vector.broadcast %13 : vector<1x128xf32> to vector<16x128xf32>
    %15 = arith.addf %12, %14 : vector<16x128xf32>
    %cst_11 = arith.constant 0.000000e+00 : f32
    %16 = vector.broadcast %cst_11 : f32 to vector<16x128xf32>
    %17 = arith.maximumf %15, %16 : vector<16x128xf32>
    %18 = arith.truncf %17 : vector<16x128xf32> to vector<16x128xbf16>
    %c0_12 = arith.constant 0 : index
    %c0_13 = arith.constant 0 : index
    %19 = vector.load %arg4[%c0_12, %c0_13] : memref<128x128xbf16, #tpu.memory_space<vmem>>, vector<128x128xbf16>
    %cst_14 = arith.constant dense<0.000000e+00> : vector<16x128xf32>
    %20 = tpu.matmul %18, %19, %cst_14 {dimension_numbers = #tpu.dot_dimension_numbers<[1], [0], [0], [1], [0, 0, 1, 1], [], []>} : vector<16x128xbf16>, vector<128x128xbf16>, vector<16x128xf32> -> vector<16x128xf32>
    %c0_15 = arith.constant 0 : index
    %c0_16 = arith.constant 0 : index
    %21 = vector.load %arg7[%c0_15, %c0_16] : memref<1x128xf32, #tpu.memory_space<vmem>>, vector<1x128xf32>
    %22 = vector.broadcast %21 : vector<1x128xf32> to vector<16x128xf32>
    %23 = arith.addf %20, %22 : vector<16x128xf32>
    %c0_17 = arith.constant 0 : index
    %c0_18 = arith.constant 0 : index
    %24 = vector.load %arg8[%c0_17, %c0_18] : memref<16x128xf32, #tpu.memory_space<vmem>>, vector<16x128xf32>
    tpu.vector_store %arg8[%c0_17, %c0_18], %23 {strides = array<i32>} : memref<16x128xf32, #tpu.memory_space<vmem>>, vector<16x128xf32>,
    return
  }
  func.func @transform_0(%arg0: i32) -> (i32, i32) {
    %c0_i32 = arith.constant 0 : i32
    %c0_i32_0 = arith.constant 0 : i32
    return %arg0, %c0_i32 : i32, i32
  }
  func.func @transform_1(%arg0: i32) -> (i32, i32) {
    %c0_i32 = arith.constant 0 : i32
    %c0_i32_0 = arith.constant 0 : i32
    %c0_i32_1 = arith.constant 0 : i32
    return %c0_i32, %c0_i32_0 : i32, i32
  }
  func.func @transform_2(%arg0: i32) -> (i32, i32) {
    %c0_i32 = arith.constant 0 : i32
    %c0_i32_0 = arith.constant 0 : i32
    %c0_i32_1 = arith.constant 0 : i32
    return %c0_i32, %c0_i32_0 : i32, i32
  }
  func.func @transform_3(%arg0: i32) -> (i32, i32) {
    %c0_i32 = arith.constant 0 : i32
    %c0_i32_0 = arith.constant 0 : i32
    %c0_i32_1 = arith.constant 0 : i32
    return %c0_i32, %c0_i32_0 : i32, i32
  }
  func.func @transform_4(%arg0: i32) -> (i32, i32) {
    %c0_i32 = arith.constant 0 : i32
    %c0_i32_0 = arith.constant 0 : i32
    %c0_i32_1 = arith.constant 0 : i32
    return %c0_i32, %c0_i32_0 : i32, i32
  }
  func.func @transform_5(%arg0: i32) -> (i32, i32) {
    %c0_i32 = arith.constant 0 : i32
    %c0_i32_0 = arith.constant 0 : i32
    %c0_i32_1 = arith.constant 0 : i32
    return %c0_i32, %c0_i32_0 : i32, i32
  }
  func.func @transform_6(%arg0: i32) -> (i32, i32) {
    %c0_i32 = arith.constant 0 : i32
    %c0_i32_0 = arith.constant 0 : i32
    %c0_i32_1 = arith.constant 0 : i32
    return %c0_i32, %c0_i32_0 : i32, i32
  }
  func.func @transform_7(%arg0: i32) -> (i32, i32) {
    %c0_i32 = arith.constant 0 : i32
    %c0_i32_0 = arith.constant 0 : i32
    return %arg0, %c0_i32 : i32, i32
  }
}

</mosaic_0001>

<bundles_post_ra>
// kernel: tpu_custom_call.1
= control target key start
LH: loop header
LB: loop body
LE: loop exit
PB: predicated region body
PF: predicated region fallthrough
CT: control target
= control target key end

     0   :  { %12 = vsyncpa [#allocation3], 0  ;;  %s899_s0 = inlined_call_operand.hbm [shape: bf16[16,128], index: 0, kind: input, shape index: {}]   ;;  %s900_s1 = inlined_call_operand.hbm [shape: bf16[128,128], index: 1, kind: input, shape index: {}]   ;;  %s901_s2 = inlined_call_operand.hbm [shape: bf16[128,128], index: 2, kind: input, shape index: {}]   ;;  %s902_s3 = inlined_call_operand.hbm [shape: bf16[128,128], index: 3, kind: input, shape index: {}]   ;;  %s903_s4 = inlined_call_operand.vmem [shape: f32[1,128], index: 4, kind: input, shape index: {}]   ;;  %s904_s5 = inlined_call_operand.vmem [shape: f32[1,128], index: 5, kind: input, shape index: {}]   ;;  %s905_s6 = inlined_call_operand.vmem [shape: f32[1,128], index: 6, kind: input, shape index: {}]   ;;  %s906_s7 = inlined_call_operand.hbm [shape: f32[16,128], index: 7, kind: output, shape index: {}]  }
   0x1   :  { %13 = vsyncpa [#allocation6], 0 }
   0x2   :  { %14 = vsyncpa [#allocation9], 0 }
   0x3   :  { %15 = vsyncpa [#allocation4], 0  ;;  %s723_s24 = smov [#allocation5]   ;;  %s724_s26 = smov [#allocation2]  }
   0x4   :  { %s33_s25 = sshll.u32 %s723_s24, 4  ;;  %s21_s27 = sshll.u32 %s724_s26, 4  ;;  %s34_s25 = int_to_ptr.vmem [resolvable:$true] %s33_s25  ;;  %s774_s27 = int_to_ptr.vmem [resolvable:$true] %s21_s27 }
   0x5   :  { %s605_s30 = scalar_lea.hbm %s900_s1, 1024 }
   0x6   :  { %p606_p0 = scmp.ne.s32.totalorder %s900_s1, %s605_s30  ;;  %p609_p1 = scmp.lt.u32.totalorder %s605_s30, %s900_s1 }
   0x8   :  { %p611_p2 = pnand %p609_p1, %p606_p0 }
   0xa   :  { %614 = shalt.err (!%p611_p2)
}
   0xb   :  { %s615_s12 = scalar_lea.vmem %s34_s25, 1024  ;;  %p620_p4 = scmp.lt.s32.totalorder %s34_s25, %s34_s25 }
   0xc   :  { %p616_p3 = scmp.ne.s32.totalorder %s34_s25, %s615_s12  ;;  %p621_p5 = scmp.lt.s32.totalorder %s615_s12, %s615_s12 }
   0xe   :  { %p622_p6 = por %p621_p5, %p620_p4 }
  0x10   :  { %p623_p7 = pnand %p622_p6, %p616_p3 }
  0x12   :  { %626 = shalt.err (!%p623_p7)
}
  0x13   :  { %s725_s13 = smov 64   ;;  %s726_s14 = smov 4  }
  0x14   :  { %39 = dma.hbm_to_vmem [thread:$0]  %s900_s1, 1024, %s34_s25, [#allocation6], %s725_s13, %s725_s13, %s726_s14  }
  0x15   :  { %s627_s19 = scalar_lea.hbm %s899_s0, 128 }
  0x16   :  { %p628_p8 = scmp.ne.s32.totalorder %s899_s0, %s627_s19  ;;  %p631_p9 = scmp.lt.u32.totalorder %s627_s19, %s899_s0 }
  0x18   :  { %p633_p10 = pnand %p631_p9, %p628_p8 }
  0x1a   :  { %636 = shalt.err (!%p633_p10)
}
  0x1b   :  { %s637_s24 = scalar_lea.vmem %s774_s27, 128  ;;  %p642_p12 = scmp.lt.s32.totalorder %s774_s27, %s774_s27 }
  0x1c   :  { %p638_p11 = scmp.ne.s32.totalorder %s774_s27, %s637_s24  ;;  %p643_p13 = scmp.lt.s32.totalorder %s637_s24, %s637_s24 }
  0x1e   :  { %p644_p0 = por %p643_p13, %p642_p12 }
  0x20   :  { %p645_p1 = pnand %p644_p0, %p638_p11 }
  0x22   :  { %648 = shalt.err (!%p645_p1)
}
  0x23   :  { %27 = dma.hbm_to_vmem [thread:$0]  %s899_s0, 128, %s774_s27, [#allocation3], %s725_s13, %s725_s13, %s726_s14  }
  0x24   :  { %s727_s26 = smov [#allocation7]   ;;  %s728_s29 = smov [#allocation8]  }
  0x25   :  { %s45_s28 = sshll.u32 %s727_s26, 4  ;;  %s57_s30 = sshll.u32 %s728_s29, 4  ;;  %s46_s28 = int_to_ptr.vmem [resolvable:$true] %s45_s28  ;;  %s811_s30 = int_to_ptr.vmem [resolvable:$true] %s57_s30 }
  0x26   :  { %s649_s10 = scalar_lea.hbm %s901_s2, 1024 }
  0x27   :  { %p650_p2 = scmp.ne.s32.totalorder %s901_s2, %s649_s10  ;;  %p653_p3 = scmp.lt.u32.totalorder %s649_s10, %s901_s2 }
  0x29   :  { %p655_p4 = pnand %p653_p3, %p650_p2 }
  0x2b   :  { %658 = shalt.err (!%p655_p4)
}
  0x2c   :  { %s659_s0 = scalar_lea.vmem %s46_s28, 1024  ;;  %p664_p6 = scmp.lt.s32.totalorder %s46_s28, %s46_s28 }
  0x2d   :  { %p660_p5 = scmp.ne.s32.totalorder %s46_s28, %s659_s0  ;;  %p665_p7 = scmp.lt.s32.totalorder %s659_s0, %s659_s0 }
  0x2f   :  { %p666_p8 = por %p665_p7, %p664_p6 }
  0x31   :  { %p667_p9 = pnand %p666_p8, %p660_p5 }
  0x33   :  { %670 = shalt.err (!%p667_p9)
}
  0x34   :  { %51 = dma.hbm_to_vmem [thread:$0]  %s901_s2, 1024, %s46_s28, [#allocation6], %s725_s13, %s725_s13, %s726_s14  }
  0x35   :  { %s671_s20 = scalar_lea.hbm %s902_s3, 1024 }
  0x36   :  { %p672_p10 = scmp.ne.s32.totalorder %s902_s3, %s671_s20  ;;  %p675_p11 = scmp.lt.u32.totalorder %s671_s20, %s902_s3 }
  0x38   :  { %p677_p12 = pnand %p675_p11, %p672_p10 }
  0x3a   :  { %680 = shalt.err (!%p677_p12)
}
  0x3b   :  { %s681_s1 = scalar_lea.vmem %s811_s30, 1024  ;;  %p686_p0 = scmp.lt.s32.totalorder %s811_s30, %s811_s30 }
  0x3c   :  { %p682_p13 = scmp.ne.s32.totalorder %s811_s30, %s681_s1  ;;  %p687_p1 = scmp.lt.s32.totalorder %s681_s1, %s681_s1 }
  0x3e   :  { %p688_p2 = por %p687_p1, %p686_p0 }
  0x40   :  { %p689_p3 = pnand %p688_p2, %p682_p13 }
  0x42   :  { %692 = shalt.err (!%p689_p3)
}
  0x43   :  { %63 = dma.hbm_to_vmem [thread:$0]  %s902_s3, 1024, %s811_s30, [#allocation9], %s725_s13, %s725_s13, %s726_s14  }
  0x44   :  { %715 = dma.done.wait [#allocation3], 128  }
  0x45   :  { %716 = vsyncadd [#allocation3], 4294967168 }
  0x46   :  { %717 = dma.done.wait [#allocation6], 2048  }
  0x47   :  { %718 = vsyncadd [#allocation6], 4294965248 }
  0x48   :  { %719 = dma.done.wait [#allocation9], 1024  }
  0x49   :  { %720 = vsyncadd [#allocation9], 4294966272  ;;  %v729_v0 = vmov 0.0   ;;  %vm730_vm0 = vmmov 0   ;;  %v580_v1 = vld [vmem:[#allocation5] sm:$0xff]   ;;  %v581_v2 = vld [vmem:[#allocation5 + $0x8] sm:$0xff]  }
  0x4a   :  { %509 = vmatprep.subr.bf16.mxu0 %v729_v0  ;;  %525 = vmatprep.mubr.msk.bf16.mxu0 %vm730_vm0, %v729_v0  ;;  %v582_v3 = vld [vmem:[#allocation5 + $0x10] sm:$0xff]   ;;  %v589_v4 = vld [vmem:[#allocation7] sm:$0xff]   ;;  %v583_v5 = vld [vmem:[#allocation5 + $0x18] sm:$0xff]   ;;  %s731_s29 = smov [#allocation10]  }
  0x4b   :  { %529 = vmatprep.subr.bf16.mxu1 %v729_v0  ;;  %545 = vmatprep.mubr.msk.bf16.mxu1 %vm730_vm0, %v729_v0  ;;  %v590_v6 = vld [vmem:[#allocation7 + $0x8] sm:$0xff]   ;;  %v584_v7 = vld [vmem:[#allocation5 + $0x20] sm:$0xff]   ;;  %v591_v8 = vld [vmem:[#allocation7 + $0x10] sm:$0xff]   ;;  %s440_s30 = sshll.u32 %s731_s29, 4  ;;  %s441_s30 = int_to_ptr.vmem [resolvable:$true] %s440_s30 }
  0x4c   :  { %510 = vmatpush3.bf16.msra.mxu0 %v580_v1  ;;  %530 = vmatpush3.bf16.msra.mxu1 %v589_v4  ;;  %v585_v9 = vld [vmem:[#allocation5 + $0x28] sm:$0xff]   ;;  %v592_v10 = vld [vmem:[#allocation7 + $0x18] sm:$0xff]   ;;  %v586_v11 = vld [vmem:[#allocation5 + $0x30] sm:$0xff]   ;;  %p698_p5 = scmp.lt.s32.totalorder %s441_s30, %s441_s30 }
  0x4d   :  { %511 = vmatprep.subr.bf16.mxu0 %v729_v0  ;;  %531 = vmatprep.subr.bf16.mxu1 %v729_v0  ;;  %v593_v12 = vld [vmem:[#allocation7 + $0x20] sm:$0xff]   ;;  %v587_v13 = vld [vmem:[#allocation5 + $0x38] sm:$0xff]   ;;  %v594_v14 = vld [vmem:[#allocation7 + $0x28] sm:$0xff]  }
  0x4e   :  { %v588_v15 = vld [vmem:[#allocation2] sm:$0xff]   ;;  %v595_v16 = vld [vmem:[#allocation7 + $0x30] sm:$0xff]   ;;  %v597_v18 = vld [vmem:[#allocation8] sm:$0xff]  }
  0x4f   :  { %v596_v17 = vld [vmem:[#allocation7 + $0x38] sm:$0xff]   ;;  %v598_v19 = vld [vmem:[#allocation8 + $0x8] sm:$0xff]   ;;  %v599_v20 = vld [vmem:[#allocation8 + $0x10] sm:$0xff]  }
  0x50   :  { %512 = vmatpush3.bf16.msra.mxu0 %v581_v2  ;;  %532 = vmatpush3.bf16.msra.mxu1 %v590_v6  ;;  %v600_v21 = vld [vmem:[#allocation8 + $0x18] sm:$0xff]   ;;  %v601_v22 = vld [vmem:[#allocation8 + $0x20] sm:$0xff]   ;;  %v602_v23 = vld [vmem:[#allocation8 + $0x28] sm:$0xff]  }
  0x51   :  { %513 = vmatprep.subr.bf16.mxu0 %v729_v0  ;;  %533 = vmatprep.subr.bf16.mxu1 %v729_v0  ;;  %v454_v24 = vld [vmem:[%s903_s4] ss:$0 sm:$0xff]  ;;  %v603_v34 = vld [vmem:[#allocation8 + $0x30] sm:$0xff]  }
  0x52   :  { %v604_v35 = vld [vmem:[#allocation8 + $0x38] sm:$0xff]  }
  0x53   :  { %v464_v36 = vld [vmem:[%s904_s5] ss:$0 sm:$0xff]  ;;  %s693_s5 = scalar_lea.vmem %s441_s30, 256 }
  0x54   :  { %514 = vmatpush3.bf16.msra.mxu0 %v582_v3  ;;  %534 = vmatpush3.bf16.msra.mxu1 %v591_v8  ;;  %v473_v46 = vld [vmem:[%s905_s6] ss:$0 sm:$0xff]  ;;  %p694_p4 = scmp.ne.s32.totalorder %s441_s30, %s693_s5  ;;  %p699_p6 = scmp.lt.s32.totalorder %s693_s5, %s693_s5 }
  0x55   :  { %515 = vmatprep.subr.bf16.mxu0 %v729_v0  ;;  %535 = vmatprep.subr.bf16.mxu1 %v729_v0 }
  0x56   :  { %p700_p7 = por %p699_p6, %p698_p5 }
  0x58   :  { %516 = vmatpush3.bf16.msra.mxu0 %v583_v5  ;;  %536 = vmatpush3.bf16.msra.mxu1 %v592_v10  ;;  %p701_p8 = pnand %p700_p7, %p694_p4 }
  0x59   :  { %517 = vmatprep.subr.bf16.mxu0 %v729_v0  ;;  %537 = vmatprep.subr.bf16.mxu1 %v729_v0 }
  0x5c   :  { %518 = vmatpush3.bf16.msra.mxu0 %v584_v7  ;;  %538 = vmatpush3.bf16.msra.mxu1 %v593_v12 }
  0x5d   :  { %519 = vmatprep.subr.bf16.mxu0 %v729_v0  ;;  %539 = vmatprep.subr.bf16.mxu1 %v729_v0 }
  0x60   :  { %520 = vmatpush3.bf16.msra.mxu0 %v585_v9  ;;  %540 = vmatpush3.bf16.msra.mxu1 %v594_v14 }
  0x61   :  { %521 = vmatprep.subr.bf16.mxu0 %v729_v0  ;;  %541 = vmatprep.subr.bf16.mxu1 %v729_v0 }
  0x64   :  { %522 = vmatpush3.bf16.msra.mxu0 %v586_v11  ;;  %542 = vmatpush3.bf16.msra.mxu1 %v595_v16 }
  0x65   :  { %523 = vmatprep.subr.bf16.mxu0 %v729_v0  ;;  %543 = vmatprep.subr.bf16.mxu1 %v729_v0 }
  0x68   :  { %524 = vmatpush3.bf16.msra.mxu0 %v587_v13  ;;  %544 = vmatpush3.bf16.msra.mxu1 %v596_v17 }
  0x69   :  { %549 = vmatprep.subr.bf16.mxu0 %v729_v0 }
  0x6b   :  { %526 = vmatmul.mubr.bf16.vlgmr.msra.gmra.mrb[0].mxu0 %v588_v15 }
  0x6c   :  { %565 = vmatprep.mubr.msk.bf16.mxu0 %vm730_vm0, %v729_v0  ;;  %550 = vmatpush3.bf16.msra.mxu0 %v597_v18 }
  0x6d   :  { %551 = vmatprep.subr.bf16.mxu0 %v729_v0 }
  0x70   :  { %552 = vmatpush3.bf16.msra.mxu0 %v598_v19 }
  0x71   :  { %553 = vmatprep.subr.bf16.mxu0 %v729_v0 }
  0x74   :  { %554 = vmatpush3.bf16.msra.mxu0 %v599_v20 }
  0x75   :  { %555 = vmatprep.subr.bf16.mxu0 %v729_v0 }
  0x78   :  { %556 = vmatpush3.bf16.msra.mxu0 %v600_v21 }
  0x79   :  { %557 = vmatprep.subr.bf16.mxu0 %v729_v0 }
  0x7c   :  { %558 = vmatpush3.bf16.msra.mxu0 %v601_v22 }
  0x7d   :  { %559 = vmatprep.subr.bf16.mxu0 %v729_v0 }
  0x80   :  { %560 = vmatpush3.bf16.msra.mxu0 %v602_v23 }
  0x81   :  { %561 = vmatprep.subr.bf16.mxu0 %v729_v0 }
  0x84   :  { %562 = vmatpush3.bf16.msra.mxu0 %v603_v34 }
  0x85   :  { %563 = vmatprep.subr.bf16.mxu0 %v729_v0 }
  0x88   :  { %564 = vmatpush3.bf16.msra.mxu0 %v604_v35 }
 0x13e   :  { %v196_v25 = vpop.f32.mrb[0].mxu0 }
 0x13f   :  { %v197_v26 = vadd.f32 %v454_v24, %v196_v25  ;;  %v527_v27 = vpop.f32.mrb[1].mxu0 }
 0x140   :  { %v199_v28 = vpop.f32.mrb[2].mxu0 }
 0x141   :  { %v200_v29 = vadd.f32 %v454_v24, %v199_v28  ;;  %v528_v30 = vpop.f32.mrb[3].mxu0  ;;  %v203_v31 = vmax.f32 %v197_v26, 0.0 }
 0x143   :  { %v204_v32 = vmax.f32 %v200_v29, 0.0 }
 0x145   :  { %v205_v33 = vpack.c.bf16 %v204_v32, %v203_v31 }
 0x147   :  { %546 = vmatmul.mubr.bf16.vlgmr.msra.gmra.mrb[0].mxu1 %v205_v33 }
 0x21a   :  { %v311_v37 = vpop.f32.mrb[0].mxu1 }
 0x21b   :  { %v312_v38 = vadd.f32 %v464_v36, %v311_v37  ;;  %v547_v39 = vpop.f32.mrb[1].mxu1 }
 0x21c   :  { %v314_v40 = vpop.f32.mrb[2].mxu1 }
 0x21d   :  { %v315_v41 = vadd.f32 %v464_v36, %v314_v40  ;;  %v548_v42 = vpop.f32.mrb[3].mxu1  ;;  %v318_v43 = vmax.f32 %v312_v38, 0.0 }
 0x21f   :  { %v319_v44 = vmax.f32 %v315_v41, 0.0 }
 0x221   :  { %v320_v45 = vpack.c.bf16 %v319_v44, %v318_v43 }
 0x223   :  { %566 = vmatmul.mubr.bf16.vlgmr.msra.gmra.mrb[4].mxu0 %v320_v45 }
 0x2f6   :  { %v426_v47 = vpop.f32.mrb[4].mxu0 }
 0x2f7   :  { %v427_v48 = vadd.f32 %v473_v46, %v426_v47  ;;  %v567_v49 = vpop.f32.mrb[5].mxu0 }
 0x2f8   :  { %v429_v50 = vpop.f32.mrb[6].mxu0 }
 0x2f9   :  { %433 = vst [vmem:[#allocation10] sm:$0xff] %v427_v48  ;;  %v430_v51 = vadd.f32 %v473_v46, %v429_v50  ;;  %v568_v52 = vpop.f32.mrb[7].mxu0 }
 0x2fb   :  { %434 = vst [vmem:[#allocation10 + $0x8] sm:$0xff] %v430_v51 }
 0x2fc   :  { %704 = shalt.err (!%p701_p8)
}
 0x2fd   :  { %s705_s9 = scalar_lea.hbm %s906_s7, 256 }
 0x2fe   :  { %p706_p9 = scmp.ne.s32.totalorder %s906_s7, %s705_s9  ;;  %p709_p10 = scmp.lt.u32.totalorder %s705_s9, %s906_s7 }
 0x300   :  { %p711_p11 = pnand %p709_p10, %p706_p9 }
 0x302   :  { %714 = shalt.err (!%p711_p11)
}
 0x303   :  { %s732_s16 = smov 128   ;;  %s733_s0 = smov 8  }
 0x304   :  { %446 = dma.vmem_to_hbm [thread:$0]  %s441_s30, 256, %s906_s7, [#allocation4], %s732_s16, %s732_s16, %s733_s0  }
 0x305   :  { %721 = dma.done.wait [#allocation4], 256  }
 0x306   :  { %722 = vsyncadd [#allocation4], 4294967040 }
 0x307   :  { %450 = vsyncpa [#allocation3], 1 }
 0x308   :  { %451 = vsyncpa [#allocation6], 1 }
 0x309   :  { %452 = vsyncpa [#allocation9], 1 }
 0x30a   :  { %453 = vsyncpa [#allocation4], 1 }

// kernel: tpu_custom_call.1
= control target key start
LH: loop header
LB: loop body
LE: loop exit
PB: predicated region body
PF: predicated region fallthrough
CT: control target
= control target key end

     0   :  { %12 = vsyncpa [#allocation3], 0  ;;  %s899_s0 = inlined_call_operand.hbm [shape: bf16[16,128], index: 0, kind: input, shape index: {}]   ;;  %s900_s1 = inlined_call_operand.hbm [shape: bf16[128,128], index: 1, kind: input, shape index: {}]   ;;  %s901_s2 = inlined_call_operand.hbm [shape: bf16[128,128], index: 2, kind: input, shape index: {}]   ;;  %s902_s3 = inlined_call_operand.hbm [shape: bf16[128,128], index: 3, kind: input, shape index: {}]   ;;  %s903_s4 = inlined_call_operand.vmem [shape: f32[1,128], index: 4, kind: input, shape index: {}]   ;;  %s904_s5 = inlined_call_operand.vmem [shape: f32[1,128], index: 5, kind: input, shape index: {}]   ;;  %s905_s6 = inlined_call_operand.vmem [shape: f32[1,128], index: 6, kind: input, shape index: {}]   ;;  %s906_s7 = inlined_call_operand.hbm [shape: f32[16,128], index: 7, kind: output, shape index: {}]  }
   0x1   :  { %13 = vsyncpa [#allocation6], 0 }
   0x2   :  { %14 = vsyncpa [#allocation9], 0 }
   0x3   :  { %15 = vsyncpa [#allocation4], 0  ;;  %s723_s24 = smov [#allocation5]   ;;  %s724_s26 = smov [#allocation2]  }
   0x4   :  { %s33_s25 = sshll.u32 %s723_s24, 4  ;;  %s21_s27 = sshll.u32 %s724_s26, 4  ;;  %s34_s25 = int_to_ptr.vmem [resolvable:$true] %s33_s25  ;;  %s774_s27 = int_to_ptr.vmem [resolvable:$true] %s21_s27 }
   0x5   :  { %s605_s30 = scalar_lea.hbm %s900_s1, 1024 }
   0x6   :  { %p606_p0 = scmp.ne.s32.totalorder %s900_s1, %s605_s30  ;;  %p609_p1 = scmp.lt.u32.totalorder %s605_s30, %s900_s1 }
   0x8   :  { %p611_p2 = pnand %p609_p1, %p606_p0 }
   0xa   :  { %614 = shalt.err (!%p611_p2)
}
   0xb   :  { %s615_s12 = scalar_lea.vmem %s34_s25, 1024  ;;  %p620_p4 = scmp.lt.s32.totalorder %s34_s25, %s34_s25 }
   0xc   :  { %p616_p3 = scmp.ne.s32.totalorder %s34_s25, %s615_s12  ;;  %p621_p5 = scmp.lt.s32.totalorder %s615_s12, %s615_s12 }
   0xe   :  { %p622_p6 = por %p621_p5, %p620_p4 }
  0x10   :  { %p623_p7 = pnand %p622_p6, %p616_p3 }
  0x12   :  { %626 = shalt.err (!%p623_p7)
}
  0x13   :  { %s725_s13 = smov 64   ;;  %s726_s14 = smov 4  }
  0x14   :  { %39 = dma.hbm_to_vmem [thread:$0]  %s900_s1, 1024, %s34_s25, [#allocation6], %s725_s13, %s725_s13, %s726_s14  }
  0x15   :  { %s627_s19 = scalar_lea.hbm %s899_s0, 128 }
  0x16   :  { %p628_p8 = scmp.ne.s32.totalorder %s899_s0, %s627_s19  ;;  %p631_p9 = scmp.lt.u32.totalorder %s627_s19, %s899_s0 }
  0x18   :  { %p633_p10 = pnand %p631_p9, %p628_p8 }
  0x1a   :  { %636 = shalt.err (!%p633_p10)
}
  0x1b   :  { %s637_s24 = scalar_lea.vmem %s774_s27, 128  ;;  %p642_p12 = scmp.lt.s32.totalorder %s774_s27, %s774_s27 }
  0x1c   :  { %p638_p11 = scmp.ne.s32.totalorder %s774_s27, %s637_s24  ;;  %p643_p13 = scmp.lt.s32.totalorder %s637_s24, %s637_s24 }
  0x1e   :  { %p644_p0 = por %p643_p13, %p642_p12 }
  0x20   :  { %p645_p1 = pnand %p644_p0, %p638_p11 }
  0x22   :  { %648 = shalt.err (!%p645_p1)
}
  0x23   :  { %27 = dma.hbm_to_vmem [thread:$0]  %s899_s0, 128, %s774_s27, [#allocation3], %s725_s13, %s725_s13, %s726_s14  }
  0x24   :  { %s727_s26 = smov [#allocation7]   ;;  %s728_s29 = smov [#allocation8]  }
  0x25   :  { %s45_s28 = sshll.u32 %s727_s26, 4  ;;  %s57_s30 = sshll.u32 %s728_s29, 4  ;;  %s46_s28 = int_to_ptr.vmem [resolvable:$true] %s45_s28  ;;  %s811_s30 = int_to_ptr.vmem [resolvable:$true] %s57_s30 }
  0x26   :  { %s649_s10 = scalar_lea.hbm %s901_s2, 1024 }
  0x27   :  { %p650_p2 = scmp.ne.s32.totalorder %s901_s2, %s649_s10  ;;  %p653_p3 = scmp.lt.u32.totalorder %s649_s10, %s901_s2 }
  0x29   :  { %p655_p4 = pnand %p653_p3, %p650_p2 }
  0x2b   :  { %658 = shalt.err (!%p655_p4)
}
  0x2c   :  { %s659_s0 = scalar_lea.vmem %s46_s28, 1024  ;;  %p664_p6 = scmp.lt.s32.totalorder %s46_s28, %s46_s28 }
  0x2d   :  { %p660_p5 = scmp.ne.s32.totalorder %s46_s28, %s659_s0  ;;  %p665_p7 = scmp.lt.s32.totalorder %s659_s0, %s659_s0 }
  0x2f   :  { %p666_p8 = por %p665_p7, %p664_p6 }
  0x31   :  { %p667_p9 = pnand %p666_p8, %p660_p5 }
  0x33   :  { %670 = shalt.err (!%p667_p9)
}
  0x34   :  { %51 = dma.hbm_to_vmem [thread:$0]  %s901_s2, 1024, %s46_s28, [#allocation6], %s725_s13, %s725_s13, %s726_s14  }
  0x35   :  { %s671_s20 = scalar_lea.hbm %s902_s3, 1024 }
  0x36   :  { %p672_p10 = scmp.ne.s32.totalorder %s902_s3, %s671_s20  ;;  %p675_p11 = scmp.lt.u32.totalorder %s671_s20, %s902_s3 }
  0x38   :  { %p677_p12 = pnand %p675_p11, %p672_p10 }
  0x3a   :  { %680 = shalt.err (!%p677_p12)
}
  0x3b   :  { %s681_s1 = scalar_lea.vmem %s811_s30, 1024  ;;  %p686_p0 = scmp.lt.s32.totalorder %s811_s30, %s811_s30 }
  0x3c   :  { %p682_p13 = scmp.ne.s32.totalorder %s811_s30, %s681_s1  ;;  %p687_p1 = scmp.lt.s32.totalorder %s681_s1, %s681_s1 }
  0x3e   :  { %p688_p2 = por %p687_p1, %p686_p0 }
  0x40   :  { %p689_p3 = pnand %p688_p2, %p682_p13 }
  0x42   :  { %692 = shalt.err (!%p689_p3)
}
  0x43   :  { %63 = dma.hbm_to_vmem [thread:$0]  %s902_s3, 1024, %s811_s30, [#allocation9], %s725_s13, %s725_s13, %s726_s14  }
  0x44   :  { %715 = dma.done.wait [#allocation3], 128  }
  0x45   :  { %716 = vsyncadd [#allocation3], 4294967168 }
  0x46   :  { %717 = dma.done.wait [#allocation6], 2048  }
  0x47   :  { %718 = vsyncadd [#allocation6], 4294965248 }
  0x48   :  { %719 = dma.done.wait [#allocation9], 1024  }
  0x49   :  { %720 = vsyncadd [#allocation9], 4294966272  ;;  %v729_v0 = vmov 0.0   ;;  %vm730_vm0 = vmmov 0   ;;  %v580_v1 = vld [vmem:[#allocation5] sm:$0xff]   ;;  %v581_v2 = vld [vmem:[#allocation5 + $0x8] sm:$0xff]  }
  0x4a   :  { %509 = vmatprep.subr.bf16.mxu0 %v729_v0  ;;  %525 = vmatprep.mubr.msk.bf16.mxu0 %vm730_vm0, %v729_v0  ;;  %v582_v3 = vld [vmem:[#allocation5 + $0x10] sm:$0xff]   ;;  %v589_v4 = vld [vmem:[#allocation7] sm:$0xff]   ;;  %v583_v5 = vld [vmem:[#allocation5 + $0x18] sm:$0xff]   ;;  %s731_s29 = smov [#allocation10]  }
  0x4b   :  { %529 = vmatprep.subr.bf16.mxu1 %v729_v0  ;;  %545 = vmatprep.mubr.msk.bf16.mxu1 %vm730_vm0, %v729_v0  ;;  %v590_v6 = vld [vmem:[#allocation7 + $0x8] sm:$0xff]   ;;  %v584_v7 = vld [vmem:[#allocation5 + $0x20] sm:$0xff]   ;;  %v591_v8 = vld [vmem:[#allocation7 + $0x10] sm:$0xff]   ;;  %s440_s30 = sshll.u32 %s731_s29, 4  ;;  %s441_s30 = int_to_ptr.vmem [resolvable:$true] %s440_s30 }
  0x4c   :  { %510 = vmatpush3.bf16.msra.mxu0 %v580_v1  ;;  %530 = vmatpush3.bf16.msra.mxu1 %v589_v4  ;;  %v585_v9 = vld [vmem:[#allocation5 + $0x28] sm:$0xff]   ;;  %v592_v10 = vld [vmem:[#allocation7 + $0x18] sm:$0xff]   ;;  %v586_v11 = vld [vmem:[#allocation5 + $0x30] sm:$0xff]   ;;  %p698_p5 = scmp.lt.s32.totalorder %s441_s30, %s441_s30 }
  0x4d   :  { %511 = vmatprep.subr.bf16.mxu0 %v729_v0  ;;  %531 = vmatprep.subr.bf16.mxu1 %v729_v0  ;;  %v593_v12 = vld [vmem:[#allocation7 + $0x20] sm:$0xff]   ;;  %v587_v13 = vld [vmem:[#allocation5 + $0x38] sm:$0xff]   ;;  %v594_v14 = vld [vmem:[#allocation7 + $0x28] sm:$0xff]  }
  0x4e   :  { %v588_v15 = vld [vmem:[#allocation2] sm:$0xff]   ;;  %v595_v16 = vld [vmem:[#allocation7 + $0x30] sm:$0xff]   ;;  %v597_v18 = vld [vmem:[#allocation8] sm:$0xff]  }
  0x4f   :  { %v596_v17 = vld [vmem:[#allocation7 + $0x38] sm:$0xff]   ;;  %v598_v19 = vld [vmem:[#allocation8 + $0x8] sm:$0xff]   ;;  %v599_v20 = vld [vmem:[#allocation8 + $0x10] sm:$0xff]  }
  0x50   :  { %512 = vmatpush3.bf16.msra.mxu0 %v581_v2  ;;  %532 = vmatpush3.bf16.msra.mxu1 %v590_v6  ;;  %v600_v21 = vld [vmem:[#allocation8 + $0x18] sm:$0xff]   ;;  %v601_v22 = vld [vmem:[#allocation8 + $0x20] sm:$0xff]   ;;  %v602_v23 = vld [vmem:[#allocation8 + $0x28] sm:$0xff]  }
  0x51   :  { %513 = vmatprep.subr.bf16.mxu0 %v729_v0  ;;  %533 = vmatprep.subr.bf16.mxu1 %v729_v0  ;;  %v454_v24 = vld [vmem:[%s903_s4] ss:$0 sm:$0xff]  ;;  %v603_v34 = vld [vmem:[#allocation8 + $0x30] sm:$0xff]  }
  0x52   :  { %v604_v35 = vld [vmem:[#allocation8 + $0x38] sm:$0xff]  }
  0x53   :  { %v464_v36 = vld [vmem:[%s904_s5] ss:$0 sm:$0xff]  ;;  %s693_s5 = scalar_lea.vmem %s441_s30, 256 }
  0x54   :  { %514 = vmatpush3.bf16.msra.mxu0 %v582_v3  ;;  %534 = vmatpush3.bf16.msra.mxu1 %v591_v8  ;;  %v473_v46 = vld [vmem:[%s905_s6] ss:$0 sm:$0xff]  ;;  %p694_p4 = scmp.ne.s32.totalorder %s441_s30, %s693_s5  ;;  %p699_p6 = scmp.lt.s32.totalorder %s693_s5, %s693_s5 }
  0x55   :  { %515 = vmatprep.subr.bf16.mxu0 %v729_v0  ;;  %535 = vmatprep.subr.bf16.mxu1 %v729_v0 }
  0x56   :  { %p700_p7 = por %p699_p6, %p698_p5 }
  0x58   :  { %516 = vmatpush3.bf16.msra.mxu0 %v583_v5  ;;  %536 = vmatpush3.bf16.msra.mxu1 %v592_v10  ;;  %p701_p8 = pnand %p700_p7, %p694_p4 }
  0x59   :  { %517 = vmatprep.subr.bf16.mxu0 %v729_v0  ;;  %537 = vmatprep.subr.bf16.mxu1 %v729_v0 }
  0x5c   :  { %518 = vmatpush3.bf16.msra.mxu0 %v584_v7  ;;  %538 = vmatpush3.bf16.msra.mxu1 %v593_v12 }
  0x5d   :  { %519 = vmatprep.subr.bf16.mxu0 %v729_v0  ;;  %539 = vmatprep.subr.bf16.mxu1 %v729_v0 }
  0x60   :  { %520 = vmatpush3.bf16.msra.mxu0 %v585_v9  ;;  %540 = vmatpush3.bf16.msra.mxu1 %v594_v14 }
  0x61   :  { %521 = vmatprep.subr.bf16.mxu0 %v729_v0  ;;  %541 = vmatprep.subr.bf16.mxu1 %v729_v0 }
  0x64   :  { %522 = vmatpush3.bf16.msra.mxu0 %v586_v11  ;;  %542 = vmatpush3.bf16.msra.mxu1 %v595_v16 }
  0x65   :  { %523 = vmatprep.subr.bf16.mxu0 %v729_v0  ;;  %543 = vmatprep.subr.bf16.mxu1 %v729_v0 }
  0x68   :  { %524 = vmatpush3.bf16.msra.mxu0 %v587_v13  ;;  %544 = vmatpush3.bf16.msra.mxu1 %v596_v17 }
  0x69   :  { %549 = vmatprep.subr.bf16.mxu0 %v729_v0 }
  0x6b   :  { %526 = vmatmul.mubr.bf16.vlgmr.msra.gmra.mrb[0].mxu0 %v588_v15 }
  0x6c   :  { %565 = vmatprep.mubr.msk.bf16.mxu0 %vm730_vm0, %v729_v0  ;;  %550 = vmatpush3.bf16.msra.mxu0 %v597_v18 }
  0x6d   :  { %551 = vmatprep.subr.bf16.mxu0 %v729_v0 }
  0x70   :  { %552 = vmatpush3.bf16.msra.mxu0 %v598_v19 }
  0x71   :  { %553 = vmatprep.subr.bf16.mxu0 %v729_v0 }
  0x74   :  { %554 = vmatpush3.bf16.msra.mxu0 %v599_v20 }
  0x75   :  { %555 = vmatprep.subr.bf16.mxu0 %v729_v0 }
  0x78   :  { %556 = vmatpush3.bf16.msra.mxu0 %v600_v21 }
  0x79   :  { %557 = vmatprep.subr.bf16.mxu0 %v729_v0 }
  0x7c   :  { %558 = vmatpush3.bf16.msra.mxu0 %v601_v22 }
  0x7d   :  { %559 = vmatprep.subr.bf16.mxu0 %v729_v0 }
  0x80   :  { %560 = vmatpush3.bf16.msra.mxu0 %v602_v23 }
  0x81   :  { %561 = vmatprep.subr.bf16.mxu0 %v729_v0 }
  0x84   :  { %562 = vmatpush3.bf16.msra.mxu0 %v603_v34 }
  0x85   :  { %563 = vmatprep.subr.bf16.mxu0 %v729_v0 }
  0x88   :  { %564 = vmatpush3.bf16.msra.mxu0 %v604_v35 }
 0x13e   :  { %v196_v25 = vpop.f32.mrb[0].mxu0 }
 0x13f   :  { %v197_v26 = vadd.f32 %v454_v24, %v196_v25  ;;  %v527_v27 = vpop.f32.mrb[1].mxu0 }
 0x140   :  { %v199_v28 = vpop.f32.mrb[2].mxu0 }
 0x141   :  { %v200_v29 = vadd.f32 %v454_v24, %v199_v28  ;;  %v528_v30 = vpop.f32.mrb[3].mxu0  ;;  %v203_v31 = vmax.f32 %v197_v26, 0.0 }
 0x143   :  { %v204_v32 = vmax.f32 %v200_v29, 0.0 }
 0x145   :  { %v205_v33 = vpack.c.bf16 %v204_v32, %v203_v31 }
 0x147   :  { %546 = vmatmul.mubr.bf16.vlgmr.msra.gmra.mrb[0].mxu1 %v205_v33 }
 0x21a   :  { %v311_v37 = vpop.f32.mrb[0].mxu1 }
 0x21b   :  { %v312_v38 = vadd.f32 %v464_v36, %v311_v37  ;;  %v547_v39 = vpop.f32.mrb[1].mxu1 }
 0x21c   :  { %v314_v40 = vpop.f32.mrb[2].mxu1 }
 0x21d   :  { %v315_v41 = vadd.f32 %v464_v36, %v314_v40  ;;  %v548_v42 = vpop.f32.mrb[3].mxu1  ;;  %v318_v43 = vmax.f32 %v312_v38, 0.0 }
 0x21f   :  { %v319_v44 = vmax.f32 %v315_v41, 0.0 }
 0x221   :  { %v320_v45 = vpack.c.bf16 %v319_v44, %v318_v43 }
 0x223   :  { %566 = vmatmul.mubr.bf16.vlgmr.msra.gmra.mrb[4].mxu0 %v320_v45 }
 0x2f6   :  { %v426_v47 = vpop.f32.mrb[4].mxu0 }
 0x2f7   :  { %v427_v48 = vadd.f32 %v473_v46, %v426_v47  ;;  %v567_v49 = vpop.f32.mrb[5].mxu0 }
 0x2f8   :  { %v429_v50 = vpop.f32.mrb[6].mxu0 }
 0x2f9   :  { %433 = vst [vmem:[#allocation10] sm:$0xff] %v427_v48  ;;  %v430_v51 = vadd.f32 %v473_v46, %v429_v50  ;;  %v568_v52 = vpop.f32.mrb[7].mxu0 }
 0x2fb   :  { %434 = vst [vmem:[#allocation10 + $0x8] sm:$0xff] %v430_v51 }
 0x2fc   :  { %704 = shalt.err (!%p701_p8)
}
 0x2fd   :  { %s705_s9 = scalar_lea.hbm %s906_s7, 256 }
 0x2fe   :  { %p706_p9 = scmp.ne.s32.totalorder %s906_s7, %s705_s9  ;;  %p709_p10 = scmp.lt.u32.totalorder %s705_s9, %s906_s7 }
 0x300   :  { %p711_p11 = pnand %p709_p10, %p706_p9 }
 0x302   :  { %714 = shalt.err (!%p711_p11)
}
 0x303   :  { %s732_s16 = smov 128   ;;  %s733_s0 = smov 8  }
 0x304   :  { %446 = dma.vmem_to_hbm [thread:$0]  %s441_s30, 256, %s906_s7, [#allocation4], %s732_s16, %s732_s16, %s733_s0  }
 0x305   :  { %721 = dma.done.wait [#allocation4], 256  }
 0x306   :  { %722 = vsyncadd [#allocation4], 4294967040 }
 0x307   :  { %450 = vsyncpa [#allocation3], 1 }
 0x308   :  { %451 = vsyncpa [#allocation6], 1 }
 0x309   :  { %452 = vsyncpa [#allocation9], 1 }
 0x30a   :  { %453 = vsyncpa [#allocation4], 1 }

</bundles_post_ra>
